<compile_context>
chip_gen: v7x
topology: tpu7x:2x2x1
jax: 0.10.0
libtpu: 0.0.40
codegen_flags: <defaults>
</compile_context>

<pallas_src>
import functools
import math

import jax
import jax.numpy as jnp
from jax import lax
from jax.experimental import pallas as pl
from jax.experimental.pallas import tpu as pltpu


# ----------------------------------------------------------------------------
# Kernel 1: router (nn.Linear(D -> 1, bias=False)), lane-dense output
# ----------------------------------------------------------------------------
def _router_kernel(hs_ref, w_ref, out_ref):
    # hs_ref : (1, TS, D)  native dtype (no f32 up-cast of MXU operands)
    # w_ref  : (1, D)      torch nn.Linear weight layout (out=1, in=D)
    # out_ref: (1, 1, TS)  f32 -- S on the 128-lane axis => full-width vst stores
    hs = hs_ref[0]                                    # (TS, D)
    w = w_ref[...]                                    # (1, D)
    # (1, D) x (TS, D) contracted over D -> (1, TS); MXU with f32 accumulator.
    y = lax.dot_general(w, hs, (((1,), (1,)), ((), ())),
                        preferred_element_type=jnp.float32)
    out_ref[0] = y


def router_pallas(hidden_states, w_router, *, seq_tile=512):
    b, s, d = hidden_states.shape
    ts = min(seq_tile, s)
    assert s % ts == 0, "sequence length must be divisible by the S tile"
    out = pl.pallas_call(
        _router_kernel,
        out_shape=jax.ShapeDtypeStruct((b, 1, s), jnp.float32),
        grid=(b, s // ts),
        in_specs=[
            pl.BlockSpec((1, ts, d), lambda i, j: (i, j, 0)),
            pl.BlockSpec((1, d), lambda i, j: (0, 0)),
        ],
        out_specs=pl.BlockSpec((1, 1, ts), lambda i, j: (i, 0, j)),
        compiler_params=pltpu.CompilerParams(
            dimension_semantics=("parallel", "arbitrary")),
    )(hidden_states, w_router)
    return out[:, 0, :]                               # (B, S) f32


# ----------------------------------------------------------------------------
# Kernel 2: fused block + in-place scatter into the aliased hidden_states buffer
# ----------------------------------------------------------------------------
def _block_scatter_kernel(idx_ref, x_ref, m_ref, ws_ref,
                          wq_ref, wk_ref, wv_ref, wo_ref,
                          hs_hbm_ref, out_hbm_ref,
                          y_ref, sem_ref, *, n_valid, scale):
    # idx_ref    : (B, N) int32 in SMEM -- selected sequence positions per batch
    # x_ref      : (1, N, D) selected tokens (native dtype)
    # m_ref      : (1, N, N) additive mask of the selected tokens (f32, padded key
    #              columns already forced to -1e9)
    # ws_ref     : (1, N, 1) router weights of the selected tokens (f32, 0 on pad)
    # w*_ref     : (D, D) block weights (native dtype -> MXU, f32 accumulate)
    # hs_hbm_ref : (B, S, D) hidden_states in HBM; aliased with out_hbm_ref, so the
    #              unselected rows are already in place and are never touched.
    # out_hbm_ref: (B, S, D) output in HBM (same buffer as hidden_states)
    # y_ref      : (1, N, D) VMEM scratch holding block(x) * router_weight
    # sem_ref    : (1,) DMA semaphore
    del hs_hbm_ref        # only present to establish the input/output aliasing
    b_idx = pl.program_id(0)

    x = x_ref[0]                                      # (N, D) native dtype
    in_dt = x.dtype

    # --- synthetic transformer block: single-head attention + residual --------
    q = jnp.dot(x, wq_ref[...], preferred_element_type=jnp.float32) * scale
    k = jnp.dot(x, wk_ref[...], preferred_element_type=jnp.float32)
    v = jnp.dot(x, wv_ref[...], preferred_element_type=jnp.float32)

    logits = jnp.dot(q, k.T, preferred_element_type=jnp.float32) + m_ref[0]
    logits = logits - jnp.max(logits, axis=-1, keepdims=True)
    p = jnp.exp(logits)
    # divide -> EUP approximate reciprocal (co-issues with MXU/VPU work)
    p = p * pl.reciprocal(jnp.sum(p, axis=-1, keepdims=True), approx=True)

    attn = jnp.dot(p.astype(in_dt), v.astype(in_dt),
                   preferred_element_type=jnp.float32)
    o = jnp.dot(attn.astype(in_dt), wo_ref[...],
                preferred_element_type=jnp.float32)
    y = x.astype(jnp.float32) + o                     # (N, D) f32

    # router-weighted output for the selected rows
    y_ref[0] = (y * ws_ref[0]).astype(y_ref.dtype)

    # --- scatter the n_valid real rows straight into the aliased HBM output ---
    # Padded rows (i >= n_valid) are never written, so no real row is clobbered.
    # TODO(synk): per-row DMAs are issued start+wait serially; double-buffering the
    # row copies would overlap them, but rows are tiny relative to the block math.
    def _scatter(i, carry):
        row = idx_ref[b_idx, i]
        cp = pltpu.make_async_copy(
            y_ref.at[:, pl.ds(i, 1), :],
            out_hbm_ref.at[pl.ds(b_idx, 1), pl.ds(row, 1), :],
            sem_ref.at[0],
        )
        cp.start()
        cp.wait()
        return carry

    lax.fori_loop(0, n_valid, _scatter, 0)


def block_scatter_pallas(hidden_states, x_sel, mask_sel, w_sel, idx, params, n_valid):
    b, s, d = hidden_states.shape
    n_pad = x_sel.shape[1]
    kernel = functools.partial(_block_scatter_kernel,
                               n_valid=n_valid, scale=1.0 / math.sqrt(d))
    return pl.pallas_call(
        kernel,
        out_shape=jax.ShapeDtypeStruct((b, s, d), hidden_states.dtype),
        grid=(b,),
        in_specs=[
            pl.BlockSpec(memory_space=pltpu.MemorySpace.SMEM),     # idx (whole, SMEM)
            pl.BlockSpec((1, n_pad, d), lambda i: (i, 0, 0)),      # selected tokens
            pl.BlockSpec((1, n_pad, n_pad), lambda i: (i, 0, 0)),  # selected mask
            pl.BlockSpec((1, n_pad, 1), lambda i: (i, 0, 0)),      # router weights
            pl.BlockSpec((d, d), lambda i: (0, 0)),                # wq
            pl.BlockSpec((d, d), lambda i: (0, 0)),                # wk
            pl.BlockSpec((d, d), lambda i: (0, 0)),                # wv
            pl.BlockSpec((d, d), lambda i: (0, 0)),                # wo
            pl.BlockSpec(memory_space=pl.ANY),                     # hidden_states (HBM)
        ],
        out_specs=pl.BlockSpec(memory_space=pl.ANY),               # aliased output (HBM)
        scratch_shapes=[
            pltpu.VMEM((1, n_pad, d), hidden_states.dtype),
            pltpu.SemaphoreType.DMA((1,)),
        ],
        # hidden_states (input index 8) IS the output buffer: unselected rows pass
        # through with zero HBM traffic; only the N selected rows are written.
        input_output_aliases={8: 0},
        compiler_params=pltpu.CompilerParams(dimension_semantics=("parallel",)),
    )(idx, x_sel, mask_sel, w_sel,
      params["wq"], params["wk"], params["wv"], params["wo"],
      hidden_states)


# ----------------------------------------------------------------------------
# MixtureOfDepth forward (glue + kernels)
# ----------------------------------------------------------------------------
def mixture_of_depth_forward(hidden_states, attention_mask, position_ids, params,
                             capacity=0.25):
    b, s, d = hidden_states.shape

    # Router: nn.Linear(hidden, 1, bias=False) -> squeeze(-1)
    weights = router_pallas(hidden_states, params["w_router"])          # (B, S) f32

    # NOTE: the PyTorch module only defines `capa` on its training path; in eval the
    # configured capacity applies.
    k = int(capacity * s)
    top_k_values = lax.top_k(weights, k)[0]
    threshold = top_k_values[:, -1]
    selected_mask = weights > threshold[:, None]                        # (B, S) bool
    # Strict `>` against the k-th largest selects exactly k-1 tokens per batch for
    # continuous router scores (same count across batches, as the module asserts).
    n_valid = k - 1
    # Pad the selected-token count up to a sublane multiple so the block kernel runs
    # on full (8, 128)-friendly tiles; padded rows are masked out and never scattered.
    n_pad = max(8, ((n_valid + 7) // 8) * 8)

    seq_ids = jnp.arange(s, dtype=jnp.int32)[None, :]
    idx = jnp.sort(jnp.where(selected_mask, seq_ids, s), axis=1)[:, :n_pad]
    idx = idx.astype(jnp.int32)                     # sentinel `s` in padded slots
    idx_g = jnp.minimum(idx, s - 1)                 # clipped indices for the gathers

    selected_tokens = jnp.take_along_axis(hidden_states, idx_g[:, :, None], axis=1)

    # selected_position_ids mirrors torch.masked_select(position_ids, selected_mask)
    selected_position_ids = jnp.take_along_axis(
        jnp.broadcast_to(position_ids, (b, s)), idx_g, axis=1)
    del selected_position_ids   # synthetic block does not consume position ids
    # TODO(synk): past_key_value / cache_position / use_cache / output_attentions of
    # the wrapped block are not modeled by the synthetic attention block.

    # attention_mask (B, 1, S, S) additive -> rows & columns of the selected tokens;
    # padded key columns are forced to -1e9 so real rows never attend to padding.
    col_valid = jnp.arange(n_pad) < n_valid
    m = attention_mask[:, 0]
    m = jnp.take_along_axis(m, idx_g[:, :, None], axis=1)
    m = jnp.take_along_axis(m, idx_g[:, None, :], axis=2)               # (B, N, N)
    mask_sel = jnp.where(col_valid[None, None, :], m, -1e9).astype(jnp.float32)

    w_sel = jnp.take_along_axis(weights, idx_g, axis=1)
    w_sel = jnp.where(col_valid[None, :], w_sel, 0.0)[:, :, None].astype(jnp.float32)

    # Fused block + scatter: selected rows <- block(x_sel) * router_weight written in
    # place into the (aliased) hidden_states buffer; unselected rows pass through.
    output = block_scatter_pallas(hidden_states, selected_tokens, mask_sel, w_sel,
                                  idx, params, n_valid)
    return (output,)


# ----------------------------------------------------------------------------
# Pure-JAX reference (for verification)
# ----------------------------------------------------------------------------
def reference_forward(hidden_states, attention_mask, position_ids, params, capacity=0.25):
    hp = lax.Precision.HIGHEST
    b, s, d = hidden_states.shape
    weights = jnp.einsum("bsd,od->bs", hidden_states, params["w_router"], precision=hp)
    k = int(capacity * s)
    thr = lax.top_k(weights, k)[0][:, -1]
    mask = weights > thr[:, None]
    n_sel = k - 1
    seq_ids = jnp.arange(s, dtype=jnp.int32)[None, :]
    idx = jnp.sort(jnp.where(mask, seq_ids, s), axis=1)[:, :n_sel]

    x = jnp.take_along_axis(hidden_states, idx[:, :, None], axis=1)
    m = attention_mask[:, 0]
    m = jnp.take_along_axis(m, idx[:, :, None], axis=1)
    m = jnp.take_along_axis(m, idx[:, None, :], axis=2)

    q = jnp.einsum("bnd,de->bne", x, params["wq"], precision=hp)
    kk = jnp.einsum("bnd,de->bne", x, params["wk"], precision=hp)
    v = jnp.einsum("bnd,de->bne", x, params["wv"], precision=hp)
    scores = jnp.einsum("bnd,bmd->bnm", q, kk, precision=hp) / math.sqrt(d) + m
    p = jax.nn.softmax(scores, axis=-1)
    attn = jnp.einsum("bnm,bmd->bnd", p, v, precision=hp)
    y = x + jnp.einsum("bnd,de->bne", attn, params["wo"], precision=hp)

    w_sel = jnp.take_along_axis(weights, idx, axis=1)
    out = hidden_states.at[jnp.arange(b)[:, None], idx].set(y * w_sel[..., None])
    return out


# ----------------------------------------------------------------------------
if __name__ == "__main__":
    key = jax.random.PRNGKey(0)
    kx, kr, kq, kk_, kv, ko = jax.random.split(key, 6)

    b, s, d = 2, 128, 128          # lane-aligned small shapes (S, D multiples of 128)
    capacity = 0.25

    hidden_states = jax.random.normal(kx, (b, s, d), jnp.float32)
    params = {
        # nn.Linear(d, 1, bias=False).weight has shape (1, d)
        "w_router": 0.1 * jax.random.normal(kr, (1, d), jnp.float32),
        # synthetic block parameters (block.hidden_size == d)
        "wq": 0.1 * jax.random.normal(kq, (d, d), jnp.float32),
        "wk": 0.1 * jax.random.normal(kk_, (d, d), jnp.float32),
        "wv": 0.1 * jax.random.normal(kv, (d, d), jnp.float32),
        "wo": 0.1 * jax.random.normal(ko, (d, d), jnp.float32),
    }

    causal = jnp.where(jnp.tril(jnp.ones((s, s), dtype=bool)), 0.0, -1e9).astype(jnp.float32)
    attention_mask = jnp.broadcast_to(causal[None, None], (b, 1, s, s))
    position_ids = jnp.arange(s, dtype=jnp.int32)[None, :]   # batch dim of 1, per module

    fwd = jax.jit(functools.partial(mixture_of_depth_forward, capacity=capacity))
    (out,) = fwd(hidden_states, attention_mask, position_ids, params)
    out = jax.block_until_ready(out)

    ref = reference_forward(hidden_states, attention_mask, position_ids, params, capacity)
    assert out.shape == (b, s, d)
    assert bool(jnp.allclose(out, ref, atol=1e-2, rtol=1e-2)), "mismatch vs pure-JAX reference"

    print("KERNEL_OK")
</pallas_src>

<mosaic_0001>
module attributes {stable_mosaic.version = 11 : i64} {
  func.func @_router_kernel(%arg0: i32, %arg1: i32, %arg2: memref<1x128x128xf32, #tpu.memory_space<vmem>>, %arg3: memref<1x128xf32, #tpu.memory_space<vmem>>, %arg4: memref<1x1x128xf32, #tpu.memory_space<vmem>>) attributes {dimension_semantics = [#tpu.dimension_semantics<parallel>, #tpu.dimension_semantics<arbitrary>], iteration_bounds = array<i64: 2, 1>, scalar_prefetch = 0 : i64, scratch_operands = 0 : i64, tpu.core_type = #tpu.core_type<tc>, window_params = [{transform_indices = @transform_0, window_bounds = array<i64: 1, 128, 128>}, {pipeline_mode = #tpu.pipeline_mode<synchronous>, transform_indices = @transform_1, window_bounds = array<i64: 1, 128>}, {transform_indices = @transform_2, window_bounds = array<i64: 1, 1, 128>}]} {
    %c0 = arith.constant 0 : index
    %c0_0 = arith.constant 0 : index
    %c0_1 = arith.constant 0 : index
    %0 = vector.load %arg2[%c0, %c0_0, %c0_1] : memref<1x128x128xf32, #tpu.memory_space<vmem>>, vector<1x128x128xf32>
    %1 = vector.shape_cast %0 : vector<1x128x128xf32> to vector<128x128xf32>
    %c0_2 = arith.constant 0 : index
    %c0_3 = arith.constant 0 : index
    %2 = vector.load %arg3[%c0_2, %c0_3] : memref<1x128xf32, #tpu.memory_space<vmem>>, vector<1x128xf32>
    %cst = arith.constant dense<0.000000e+00> : vector<1x128xf32>
    %3 = tpu.matmul %2, %1, %cst {dimension_numbers = #tpu.dot_dimension_numbers<[1], [1], [0], [0], [0, 0, 1, 0], [], []>} : vector<1x128xf32>, vector<128x128xf32>, vector<1x128xf32> -> vector<1x128xf32>
    %c0_4 = arith.constant 0 : index
    %c0_5 = arith.constant 0 : index
    %c0_6 = arith.constant 0 : index
    %4 = vector.load %arg4[%c0_4, %c0_5, %c0_6] : memref<1x1x128xf32, #tpu.memory_space<vmem>>, vector<1x1x128xf32>
    %5 = vector.shape_cast %4 : vector<1x1x128xf32> to vector<1x128xf32>
    %6 = vector.shape_cast %3 : vector<1x128xf32> to vector<1x1x128xf32>
    tpu.vector_store %arg4[%c0_4, %c0_5, %c0_6], %6 {strides = array<i32>} : memref<1x1x128xf32, #tpu.memory_space<vmem>>, vector<1x1x128xf32>,
    return
  }
  func.func @transform_0(%arg0: i32, %arg1: i32) -> (i32, i32, i32) {
    %c0_i32 = arith.constant 0 : i32
    %c0_i32_0 = arith.constant 0 : i32
    return %arg0, %arg1, %c0_i32 : i32, i32, i32
  }
  func.func @transform_1(%arg0: i32, %arg1: i32) -> (i32, i32) {
    %c0_i32 = arith.constant 0 : i32
    %c0_i32_0 = arith.constant 0 : i32
    %c0_i32_1 = arith.constant 0 : i32
    return %c0_i32, %c0_i32_0 : i32, i32
  }
  func.func @transform_2(%arg0: i32, %arg1: i32) -> (i32, i32, i32) {
    %c0_i32 = arith.constant 0 : i32
    %c0_i32_0 = arith.constant 0 : i32
    return %arg0, %c0_i32, %arg1 : i32, i32, i32
  }
}

module attributes {stable_mosaic.version = 11 : i64} {
  func.func @_block_scatter_kernel(%arg0: i32, %arg1: memref<2x32xi32, #tpu.memory_space<smem>>, %arg2: memref<1x32x128xf32, #tpu.memory_space<vmem>>, %arg3: memref<1x32x32xf32, #tpu.memory_space<vmem>>, %arg4: memref<1x32x1xf32, #tpu.memory_space<vmem>>, %arg5: memref<128x128xf32, #tpu.memory_space<vmem>>, %arg6: memref<128x128xf32, #tpu.memory_space<vmem>>, %arg7: memref<128x128xf32, #tpu.memory_space<vmem>>, %arg8: memref<128x128xf32, #tpu.memory_space<vmem>>, %arg9: memref<2x128x128xf32, #tpu.memory_space<any>>, %arg10: memref<2x128x128xf32, #tpu.memory_space<any>>, %arg11: memref<1x32x128xf32, #tpu.memory_space<vmem>>, %arg12: memref<1x!tpu.dma_semaphore, #tpu.memory_space<semaphore_mem>>) attributes {dimension_semantics = [#tpu.dimension_semantics<parallel>], iteration_bounds = array<i64: 2>, scalar_prefetch = 0 : i64, scratch_operands = 2 : i64, tpu.core_type = #tpu.core_type<tc>, window_params = [{transform_indices = @transform_0, window_bounds = array<i64: 2, 32>}, {transform_indices = @transform_1, window_bounds = array<i64: 1, 32, 128>}, {transform_indices = @transform_2, window_bounds = array<i64: 1, 32, 32>}, {transform_indices = @transform_3, window_bounds = array<i64: 1, 32, 1>}, {pipeline_mode = #tpu.pipeline_mode<synchronous>, transform_indices = @transform_4, window_bounds = array<i64: 128, 128>}, {pipeline_mode = #tpu.pipeline_mode<synchronous>, transform_indices = @transform_5, window_bounds = array<i64: 128, 128>}, {pipeline_mode = #tpu.pipeline_mode<synchronous>, transform_indices = @transform_6, window_bounds = array<i64: 128, 128>}, {pipeline_mode = #tpu.pipeline_mode<synchronous>, transform_indices = @transform_7, window_bounds = array<i64: 128, 128>}, {}, {}]} {
    %c0 = arith.constant 0 : index
    %c0_0 = arith.constant 0 : index
    %c0_1 = arith.constant 0 : index
    %0 = vector.load %arg2[%c0, %c0_0, %c0_1] : memref<1x32x128xf32, #tpu.memory_space<vmem>>, vector<1x32x128xf32>
    %1 = vector.shape_cast %0 : vector<1x32x128xf32> to vector<32x128xf32>
    %c0_2 = arith.constant 0 : index
    %c0_3 = arith.constant 0 : index
    %2 = vector.load %arg5[%c0_2, %c0_3] : memref<128x128xf32, #tpu.memory_space<vmem>>, vector<128x128xf32>
    %cst = arith.constant dense<0.000000e+00> : vector<32x128xf32>
    %3 = tpu.matmul %1, %2, %cst {dimension_numbers = #tpu.dot_dimension_numbers<[1], [0], [0], [1], [0, 0, 1, 1], [], []>} : vector<32x128xf32>, vector<128x128xf32>, vector<32x128xf32> -> vector<32x128xf32>
    %cst_4 = arith.constant 0.0883883461 : f32
    %4 = vector.broadcast %cst_4 : f32 to vector<32x128xf32>
    %5 = arith.mulf %3, %4 : vector<32x128xf32>
    %c0_5 = arith.constant 0 : index
    %c0_6 = arith.constant 0 : index
    %6 = vector.load %arg6[%c0_5, %c0_6] : memref<128x128xf32, #tpu.memory_space<vmem>>, vector<128x128xf32>
    %cst_7 = arith.constant dense<0.000000e+00> : vector<32x128xf32>
    %7 = tpu.matmul %1, %6, %cst_7 {dimension_numbers = #tpu.dot_dimension_numbers<[1], [0], [0], [1], [0, 0, 1, 1], [], []>} : vector<32x128xf32>, vector<128x128xf32>, vector<32x128xf32> -> vector<32x128xf32>
    %c0_8 = arith.constant 0 : index
    %c0_9 = arith.constant 0 : index
    %8 = vector.load %arg7[%c0_8, %c0_9] : memref<128x128xf32, #tpu.memory_space<vmem>>, vector<128x128xf32>
    %cst_10 = arith.constant dense<0.000000e+00> : vector<32x128xf32>
    %9 = tpu.matmul %1, %8, %cst_10 {dimension_numbers = #tpu.dot_dimension_numbers<[1], [0], [0], [1], [0, 0, 1, 1], [], []>} : vector<32x128xf32>, vector<128x128xf32>, vector<32x128xf32> -> vector<32x128xf32>
    %10 = tpu.transpose %7, [1, 0] : vector<32x128xf32> -> vector<128x32xf32>
    %cst_11 = arith.constant dense<0.000000e+00> : vector<32x32xf32>
    %11 = tpu.matmul %5, %10, %cst_11 {dimension_numbers = #tpu.dot_dimension_numbers<[1], [0], [0], [1], [0, 0, 1, 1], [], []>} : vector<32x128xf32>, vector<128x32xf32>, vector<32x32xf32> -> vector<32x32xf32>
    %c0_12 = arith.constant 0 : index
    %c0_13 = arith.constant 0 : index
    %c0_14 = arith.constant 0 : index
    %12 = vector.load %arg3[%c0_12, %c0_13, %c0_14] : memref<1x32x32xf32, #tpu.memory_space<vmem>>, vector<1x32x32xf32>
    %13 = vector.shape_cast %12 : vector<1x32x32xf32> to vector<32x32xf32>
    %14 = arith.addf %11, %13 : vector<32x32xf32>
    %cst_15 = arith.constant dense<0xFF800000> : vector<32xf32>
    %15 = vector.multi_reduction <maximumf>, %14, %cst_15 [1] : vector<32x32xf32> to vector<32xf32>
    %16 = vector.shape_cast %15 : vector<32xf32> to vector<32x1xf32>
    %17 = vector.broadcast %16 : vector<32x1xf32> to vector<32x32xf32>
    %18 = arith.subf %14, %17 : vector<32x32xf32>
    %19 = math.exp %18 : vector<32x32xf32>
    %cst_16 = arith.constant dense<0.000000e+00> : vector<32xf32>
    %20 = vector.multi_reduction <add>, %19, %cst_16 [1] : vector<32x32xf32> to vector<32xf32>
    %21 = vector.shape_cast %20 : vector<32xf32> to vector<32x1xf32>
    %22 = tpu.reciprocal %21 {approx = true} : vector<32x1xf32> -> vector<32x1xf32>
    %23 = vector.broadcast %22 : vector<32x1xf32> to vector<32x32xf32>
    %24 = arith.mulf %19, %23 : vector<32x32xf32>
    %cst_17 = arith.constant dense<0.000000e+00> : vector<32x128xf32>
    %25 = tpu.matmul %24, %9, %cst_17 {dimension_numbers = #tpu.dot_dimension_numbers<[1], [0], [0], [1], [0, 0, 1, 1], [], []>} : vector<32x32xf32>, vector<32x128xf32>, vector<32x128xf32> -> vector<32x128xf32>
    %c0_18 = arith.constant 0 : index
    %c0_19 = arith.constant 0 : index
    %26 = vector.load %arg8[%c0_18, %c0_19] : memref<128x128xf32, #tpu.memory_space<vmem>>, vector<128x128xf32>
    %cst_20 = arith.constant dense<0.000000e+00> : vector<32x128xf32>
    %27 = tpu.matmul %25, %26, %cst_20 {dimension_numbers = #tpu.dot_dimension_numbers<[1], [0], [0], [1], [0, 0, 1, 1], [], []>} : vector<32x128xf32>, vector<128x128xf32>, vector<32x128xf32> -> vector<32x128xf32>
    %28 = arith.addf %1, %27 : vector<32x128xf32>
    %c0_21 = arith.constant 0 : index
    %c0_22 = arith.constant 0 : index
    %c0_23 = arith.constant 0 : index
    %29 = vector.load %arg4[%c0_21, %c0_22, %c0_23] : memref<1x32x1xf32, #tpu.memory_space<vmem>>, vector<1x32x1xf32>
    %30 = vector.shape_cast %29 : vector<1x32x1xf32> to vector<32x1xf32>
    %31 = vector.broadcast %30 : vector<32x1xf32> to vector<32x128xf32>
    %32 = arith.mulf %28, %31 : vector<32x128xf32>
    %c0_24 = arith.constant 0 : index
    %c0_25 = arith.constant 0 : index
    %c0_26 = arith.constant 0 : index
    %33 = vector.load %arg11[%c0_24, %c0_25, %c0_26] : memref<1x32x128xf32, #tpu.memory_space<vmem>>, vector<1x32x128xf32>
    %34 = vector.shape_cast %33 : vector<1x32x128xf32> to vector<32x128xf32>
    %35 = vector.shape_cast %32 : vector<32x128xf32> to vector<1x32x128xf32>
    tpu.vector_store %arg11[%c0_24, %c0_25, %c0_26], %35 {strides = array<i32>} : memref<1x32x128xf32, #tpu.memory_space<vmem>>, vector<1x32x128xf32>,
    %c0_i32 = arith.constant 0 : i32
    %c31_i32 = arith.constant 31 : i32
    %36 = arith.addi %c0_i32, %c31_i32 : i32
    %c1_i32 = arith.constant 1 : i32
    scf.for %arg13 = %c0_i32 to %36 step %c1_i32  : i32 {
      %37 = arith.index_cast %arg0 : i32 to index
      %38 = arith.index_cast %arg13 : i32 to index
      %39 = memref.load %arg1[%37, %38] : memref<2x32xi32, #tpu.memory_space<smem>>
      %c0_i32_28 = arith.constant 0 : i32
      %c0_i32_29 = arith.constant 0 : i32
      %c0_i32_30 = arith.constant 0 : i32
      %40 = tpu.memref_slice %arg11[%c0_i32_29, %arg13, %c0_i32_30] : memref<1x32x128xf32, #tpu.memory_space<vmem>> -> memref<1x1x128xf32, #tpu.memory_space<vmem>>
      %c0_i32_31 = arith.constant 0 : i32
      %41 = tpu.memref_slice %arg10[%arg0, %39, %c0_i32_31] : memref<2x128x128xf32, #tpu.memory_space<any>> -> memref<1x1x128xf32, #tpu.memory_space<any>>
      %42 = tpu.memref_slice %arg12[%c0_i32_28] : memref<1x!tpu.dma_semaphore, #tpu.memory_space<semaphore_mem>> -> memref<1x!tpu.dma_semaphore, #tpu.memory_space<semaphore_mem>>
      %43 = tpu.memref_squeeze %42 : memref<1x!tpu.dma_semaphore, #tpu.memory_space<semaphore_mem>> -> memref<!tpu.dma_semaphore, #tpu.memory_space<semaphore_mem>>
      tpu.enqueue_dma source(%40 : memref<1x1x128xf32, #tpu.memory_space<vmem>>) target(%41 : memref<1x1x128xf32, #tpu.memory_space<any>>) target_semaphore(%43 : memref<!tpu.dma_semaphore, #tpu.memory_space<semaphore_mem>>)
      %c0_i32_32 = arith.constant 0 : i32
      %c0_i32_33 = arith.constant 0 : i32
      %c0_i32_34 = arith.constant 0 : i32
      %44 = tpu.memref_slice %arg11[%c0_i32_33, %arg13, %c0_i32_34] : memref<1x32x128xf32, #tpu.memory_space<vmem>> -> memref<1x1x128xf32, #tpu.memory_space<vmem>>
      %c0_i32_35 = arith.constant 0 : i32
      %45 = tpu.memref_slice %arg10[%arg0, %39, %c0_i32_35] : memref<2x128x128xf32, #tpu.memory_space<any>> -> memref<1x1x128xf32, #tpu.memory_space<any>>
      %46 = tpu.memref_slice %arg12[%c0_i32_32] : memref<1x!tpu.dma_semaphore, #tpu.memory_space<semaphore_mem>> -> memref<1x!tpu.dma_semaphore, #tpu.memory_space<semaphore_mem>>
      %47 = tpu.memref_squeeze %46 : memref<1x!tpu.dma_semaphore, #tpu.memory_space<semaphore_mem>> -> memref<!tpu.dma_semaphore, #tpu.memory_space<semaphore_mem>>
      tpu.wait_dma2 semaphore(%47 : memref<!tpu.dma_semaphore, #tpu.memory_space<semaphore_mem>>) src(%44 : memref<1x1x128xf32, #tpu.memory_space<vmem>>) dst(%45 : memref<1x1x128xf32, #tpu.memory_space<any>>)
    }
    %c31_i32_27 = arith.constant 31 : i32
    return
  }
  func.func @transform_0(%arg0: i32) -> (i32, i32) {
    %c0_i32 = arith.constant 0 : i32
    %c0_i32_0 = arith.constant 0 : i32
    %c0_i32_1 = arith.constant 0 : i32
    return %c0_i32, %c0_i32_0 : i32, i32
  }
  func.func @transform_1(%arg0: i32) -> (i32, i32, i32) {
    %c0_i32 = arith.constant 0 : i32
    %c0_i32_0 = arith.constant 0 : i32
    %c0_i32_1 = arith.constant 0 : i32
    return %arg0, %c0_i32, %c0_i32_0 : i32, i32, i32
  }
  func.func @transform_2(%arg0: i32) -> (i32, i32, i32) {
    %c0_i32 = arith.constant 0 : i32
    %c0_i32_0 = arith.constant 0 : i32
    %c0_i32_1 = arith.constant 0 : i32
    return %arg0, %c0_i32, %c0_i32_0 : i32, i32, i32
  }
  func.func @transform_3(%arg0: i32) -> (i32, i32, i32) {
    %c0_i32 = arith.constant 0 : i32
    %c0_i32_0 = arith.constant 0 : i32
    %c0_i32_1 = arith.constant 0 : i32
    return %arg0, %c0_i32, %c0_i32_0 : i32, i32, i32
  }
  func.func @transform_4(%arg0: i32) -> (i32, i32) {
    %c0_i32 = arith.constant 0 : i32
    %c0_i32_0 = arith.constant 0 : i32
    %c0_i32_1 = arith.constant 0 : i32
    return %c0_i32, %c0_i32_0 : i32, i32
  }
  func.func @transform_5(%arg0: i32) -> (i32, i32) {
    %c0_i32 = arith.constant 0 : i32
    %c0_i32_0 = arith.constant 0 : i32
    %c0_i32_1 = arith.constant 0 : i32
    return %c0_i32, %c0_i32_0 : i32, i32
  }
  func.func @transform_6(%arg0: i32) -> (i32, i32) {
    %c0_i32 = arith.constant 0 : i32
    %c0_i32_0 = arith.constant 0 : i32
    %c0_i32_1 = arith.constant 0 : i32
    return %c0_i32, %c0_i32_0 : i32, i32
  }
  func.func @transform_7(%arg0: i32) -> (i32, i32) {
    %c0_i32 = arith.constant 0 : i32
    %c0_i32_0 = arith.constant 0 : i32
    %c0_i32_1 = arith.constant 0 : i32
    return %c0_i32, %c0_i32_0 : i32, i32
  }
}

</mosaic_0001>

<bundles_post_ra>
// kernel: mixture_of_depth_forward.2
= control target key start
LH: loop header
LB: loop body
LE: loop exit
PB: predicated region body
PF: predicated region fallthrough
CT: control target
= control target key end

     0   :  { %s490_s9 = smov 0   ;;  %s492_s10 = smov 0   ;;  %s548_s0 = inlined_call_operand.vmem [shape: f32[2,128,128], index: 0, kind: input, shape index: {}]   ;;  %s549_s1 = inlined_call_operand.vmem [shape: f32[1,128], index: 1, kind: input, shape index: {}]   ;;  %s550_s2 = inlined_call_operand.vmem [shape: f32[2,1,128], index: 2, kind: output, shape index: {}]  }
   0x1   :  { %s494_s11 = smov 0  }
   0x2 LB: > { %s24_s12 = sadd.s32 1, %s466_s10  ;;  %p339_p0 = scmp.ge.s32.totalorder %s470_s11, 1  ;;  %s470_s11 = sphi %s494_s11, %s12_s11   ;;  %s466_s10 = sphi %s492_s10, %s552_s10   ;;  %s462_s9 = sphi %s490_s9, %s551_s9  }
   0x3   : > { %p26_p1 = scmp.ge.s32.totalorder %s24_s12, 2  ;;  %p133_p2 = scmp.lt.s32.totalorder %s470_s11, 3 }
   0x5   : > { %s554_s12 = smov (%p26_p1, %s24_s12), 0  ;;  %p134_p3 = pnand %p339_p0, %p133_p2 }
   0x6   : > { %p161_p4 = scmp.lt.s32.totalorder (!%p134_p3), %s462_s9, 1  ;;  %v472_v0 = vmov (!%p134_p3), 0.0|0.0   ;;  %vm473_vm0 = vmmov (!%p134_p3), 0   ;;  %v474_v1 = vmov (!%p134_p3), 0.0   ;;  %v192_v26 = vld [vmem:[%s549_s1] sm:$0x1] (!%p134_p3) }
   0x7   : > { %137 = sbr.rel (%p134_p3) target bundleno = 296 (0x128), region = 28  ;;  %397 = vmatprep.subr.bf16.mxu0 (!%p134_p3), %v472_v0  ;;  %394 = vmatprep.mubr.msk.f32.mxu0 (!%p134_p3), %vm473_vm0, %v474_v1 }
   0xe   : > { %s556_s9 = smov (!%p161_p4, %s462_s9), 1 }
   0xf   : > { %s344_s13 = sshll.u32 %s556_s9, 7  ;;  %s175_s21 = scalar_lea.vmem %s550_s2, %s556_s9 }
  0x10   : > { %s514_s16 = scalar_lea.vmem %s548_s0, %s344_s13 }
  0x11   : > { %v176_v2 = vld [vmem:[%s514_s16] sm:$0xff]  ;;  %v177_v3 = vld [vmem:[%s514_s16 + $0x8] sm:$0xff]  ;;  %v178_v5 = vld [vmem:[%s514_s16 + $0x10] sm:$0xff] }
  0x12   : > { %v398_v4 = vpack.c.bf16 %v177_v3, %v176_v2  ;;  %v179_v6 = vld [vmem:[%s514_s16 + $0x18] sm:$0xff]  ;;  %v180_v8 = vld [vmem:[%s514_s16 + $0x20] sm:$0xff]  ;;  %v181_v9 = vld [vmem:[%s514_s16 + $0x28] sm:$0xff] }
  0x13   : > { %v401_v7 = vpack.c.bf16 %v179_v6, %v178_v5  ;;  %v404_v10 = vpack.c.bf16 %v181_v9, %v180_v8  ;;  %v182_v11 = vld [vmem:[%s514_s16 + $0x30] sm:$0xff]  ;;  %v183_v12 = vld [vmem:[%s514_s16 + $0x38] sm:$0xff]  ;;  %v184_v14 = vld [vmem:[%s514_s16 + $0x40] sm:$0xff] }
  0x14   : > { %399 = vmatpush3.bf16.xpose.msra.mxu0 %v398_v4  ;;  %v407_v13 = vpack.c.bf16 %v183_v12, %v182_v11  ;;  %v185_v15 = vld [vmem:[%s514_s16 + $0x48] sm:$0xff]  ;;  %v186_v17 = vld [vmem:[%s514_s16 + $0x50] sm:$0xff]  ;;  %v187_v18 = vld [vmem:[%s514_s16 + $0x58] sm:$0xff] }
  0x15   : > { %400 = vmatprep.subr.bf16.mxu0 %v472_v0  ;;  %v410_v16 = vpack.c.bf16 %v185_v15, %v184_v14  ;;  %v413_v19 = vpack.c.bf16 %v187_v18, %v186_v17  ;;  %v188_v20 = vld [vmem:[%s514_s16 + $0x60] sm:$0xff]  ;;  %v189_v21 = vld [vmem:[%s514_s16 + $0x68] sm:$0xff]  ;;  %v190_v23 = vld [vmem:[%s514_s16 + $0x70] sm:$0xff] }
  0x16   : > { %v416_v22 = vpack.c.bf16 %v189_v21, %v188_v20  ;;  %v191_v24 = vld [vmem:[%s514_s16 + $0x78] sm:$0xff] }
  0x17   : > { %v419_v25 = vpack.c.bf16 %v191_v24, %v190_v23 }
  0x1c   : > { %402 = vmatpush3.bf16.xpose.msra.mxu0 %v401_v7 }
  0x1d   : > { %403 = vmatprep.subr.bf16.mxu0 %v472_v0 }
  0x24   : > { %405 = vmatpush3.bf16.xpose.msra.mxu0 %v404_v10 }
  0x25   : > { %406 = vmatprep.subr.bf16.mxu0 %v472_v0 }
  0x2c   : > { %408 = vmatpush3.bf16.xpose.msra.mxu0 %v407_v13 }
  0x2d   : > { %409 = vmatprep.subr.bf16.mxu0 %v472_v0 }
  0x34   : > { %411 = vmatpush3.bf16.xpose.msra.mxu0 %v410_v16 }
  0x35   : > { %412 = vmatprep.subr.bf16.mxu0 %v472_v0 }
  0x3c   : > { %414 = vmatpush3.bf16.xpose.msra.mxu0 %v413_v19 }
  0x3d   : > { %415 = vmatprep.subr.bf16.mxu0 %v472_v0 }
  0x44   : > { %417 = vmatpush3.bf16.xpose.msra.mxu0 %v416_v22 }
  0x45   : > { %418 = vmatprep.subr.bf16.mxu0 %v472_v0 }
  0x4c   : > { %420 = vmatpush3.bf16.xpose.msra.mxu0 %v419_v25 }
  0x53   : > { %395 = vmatmul.mubr.f32.vlgmr.msra.gmra.mrb[0].mxu0 %v192_v26 }
 0x126   : > { %v259_v27 = vpop.f32.mrb[0].mxu0 }
 0x127   : > { %263 = vst [vmem:[%s175_s21] sm:$0x1] %v259_v27  ;;  %v396_v28 = vpop.f32.mrb[1].mxu0 }
 0x128 PF: > { %s12_s11 = sadd.s32 1, %s470_s11   ;;  %s551_s9 = smov %s466_s10 }
 0x129   : > { %p9_p5 = scmp.ge.s32.totalorder %s12_s11, 4   ;;  %s552_s10 = smov %s554_s12 }
 0x12b   :  { %11 = sbr.rel (!%p9_p5) target bundleno = 2 (0x2), region = 58 }

// kernel: mixture_of_depth_forward.3
= control target key start
LH: loop header
LB: loop body
LE: loop exit
PB: predicated region body
PF: predicated region fallthrough
CT: control target
= control target key end

     0   :  { %14 = vsyncpa [#allocation5], 0  ;;  %s1650_s30 = smov 0   ;;  %s1947_s0 = inlined_call_operand.vmem [shape: s32[2,32], index: 0, kind: input, shape index: {}]   ;;  %s1948_s1 = inlined_call_operand.vmem [shape: f32[2,32,128], index: 1, kind: input, shape index: {}]   ;;  %s1949_s2 = inlined_call_operand.vmem [shape: f32[2,32,32], index: 2, kind: input, shape index: {}]   ;;  %s1950_s3 = inlined_call_operand.vmem [shape: f32[2,32,1], index: 3, kind: input, shape index: {}]   ;;  %s1951_s4 = inlined_call_operand.vmem [shape: f32[128,128], index: 4, kind: input, shape index: {}]   ;;  %s1952_s5 = inlined_call_operand.vmem [shape: f32[128,128], index: 5, kind: input, shape index: {}]   ;;  %s1953_s6 = inlined_call_operand.vmem [shape: f32[128,128], index: 6, kind: input, shape index: {}]   ;;  %s1954_s7 = inlined_call_operand.vmem [shape: f32[128,128], index: 7, kind: input, shape index: {}]   ;;  %s1955_s8 = inlined_call_operand.hbm [shape: f32[2,128,128], index: 8, kind: input, shape index: {}, may-alias: {8,9}]   ;;  %s1956_s9 = inlined_call_operand.hbm [shape: f32[2,128,128], index: 9, kind: output, shape index: {}, may-alias: {8,9}]  }
   0x1 LB: > { %s162_s12 = sshll.u32 %s1947_s0, 4  ;;  %s1659_s13 = sadd.s32 4294967295, %s1591_s30   ;;  %s1591_s30 = sphi %s1650_s30, %s20_s30   ;;  %s163_s12 = int_to_ptr.vmem [resolvable:$true] %s162_s12 }
   0x2   : > { %p1046_p0 = scmp.lt.s32.totalorder %s1591_s30, 1  ;;  %p1497_p1 = scmp.ge.s32.totalorder %s1591_s30, 1 }
   0x3   : > { %p1498_p2 = scmp.eq.s32.totalorder %s1659_s13, 0  ;;  %s1536_s8 = scalar_lea.vmem %s163_s12, 32 }
   0x4   : > { %p1537_p4 = scmp.ne.s32.totalorder %s163_s12, %s1536_s8  ;;  %p1544_p8 = scmp.lt.s32.totalorder %s163_s12, %s163_s12 }
   0x5   : > { %p1494_p3 = pnand %p1498_p2, %p1497_p1  ;;  %p1545_p9 = scmp.lt.s32.totalorder %s1536_s8, %s1536_s8 }
   0x7   : > { %p1538_p5 = pneg %p1494_p3  ;;  %p1546_p10 = por %p1545_p9, %p1544_p8 }
   0x9   : > { %p1539_p6 = pnand %p1538_p5, %p1537_p4 }
   0xb   : > { %p1540_p7 = pneg %p1539_p6 }
   0xd   : > { %p1547_p11 = pnand %p1546_p10, %p1540_p7 }
   0xf   : > { %1550 = shalt.err (!%p1547_p11)
}
  0x10   : > { %s1597_s14 = smov [#allocation4]   ;;  %209 = sbr.rel (%p1046_p0) target bundleno = 1299 (0x513), region = 52 }
  0x11   : > { %1496 = dma.vmem_to_smem (!%p1494_p3), %s163_s12, 32, %s1597_s14, [#allocation5]  }
  0x17   : > { %1584 = dma.done.wait (%p1498_p2), [#allocation5], 32  }
  0x18   : > { %1586 = vsyncadd (%p1498_p2), [#allocation5], 4294967264 }
  0x19   : > { %215 = sfence }
  0x1a   : > { %v371_v0 = vld [vmem:[%s1952_s5] sm:$0xff]  ;;  %v372_v1 = vld [vmem:[%s1952_s5 + $0x8] sm:$0xff]  ;;  %v373_v2 = vld [vmem:[%s1952_s5 + $0x10] sm:$0xff]  ;;  %p247_p12 = scmp.lt.s32.totalorder %s1659_s13, 1  ;;  %vm662_vm0 = vcmask 261120  }
  0x1b   : > { %v1377_v3 = vpack.c.bf16 %v372_v1, %v371_v0  ;;  %v374_v4 = vld [vmem:[%s1952_s5 + $0x18] sm:$0xff]  ;;  %v375_v6 = vld [vmem:[%s1952_s5 + $0x20] sm:$0xff]  ;;  %v376_v7 = vld [vmem:[%s1952_s5 + $0x28] sm:$0xff] }
  0x1c   : > { %v1381_v5 = vpack.c.bf16 %v374_v4, %v373_v2  ;;  %v266_v8 = vld [vmem:[%s1951_s4] sm:$0xff]  ;;  %s248_s29 = scalar_select %p247_p12, %s1659_s13, 1  ;;  %v267_v9 = vld [vmem:[%s1951_s4 + $0x8] sm:$0xff]  ;;  %v268_v11 = vld [vmem:[%s1951_s4 + $0x10] sm:$0xff]  ;;  %v1385_v13 = vpack.c.bf16 %v376_v7, %v375_v6 }
  0x1d   : > { %1378 = vmatprep.subr.bf16.mxu1 %v1377_v3  ;;  %v1345_v10 = vpack.c.bf16 %v267_v9, %v266_v8  ;;  %v269_v12 = vld [vmem:[%s1951_s4 + $0x18] sm:$0xff]  ;;  %v270_v15 = vld [vmem:[%s1951_s4 + $0x20] sm:$0xff]  ;;  %v271_v16 = vld [vmem:[%s1951_s4 + $0x28] sm:$0xff] }
  0x1e   : > { %1380 = vmatpush3.bf16.msra.mxu1 %v1377_v3  ;;  %s1704_s16 = sshll.u32 %s248_s29, 5  ;;  %v1349_v14 = vpack.c.bf16 %v269_v12, %v268_v11  ;;  %v377_v17 = vld [vmem:[%s1952_s5 + $0x30] sm:$0xff]  ;;  %v378_v18 = vld [vmem:[%s1952_s5 + $0x38] sm:$0xff]  ;;  %v1353_v19 = vpack.c.bf16 %v271_v16, %v270_v15  ;;  %v379_v24 = vld [vmem:[%s1952_s5 + $0x40] sm:$0xff] }
  0x1f   : > { %1382 = vmatprep.subr.bf16.mxu1 %v1381_v5  ;;  %s1716_s23 = scalar_lea.vmem %s1948_s1, %s1704_s16  ;;  %1346 = vmatprep.subr.bf16.mxu0 %v1345_v10  ;;  %v1389_v21 = vpack.c.bf16 %v378_v18, %v377_v17  ;;  %v272_v22 = vld [vmem:[%s1951_s4 + $0x30] sm:$0xff]  ;;  %v273_v23 = vld [vmem:[%s1951_s4 + $0x38] sm:$0xff]  ;;  %v380_v25 = vld [vmem:[%s1952_s5 + $0x48] sm:$0xff]  ;;  %s256_s24 = scalar_lea.vmem %s1949_s2, %s1704_s16 }
  0x20   : > { %1348 = vmatpush3.bf16.msra.mxu0 %v1345_v10  ;;  %v1725_v20 = vld [vmem:[%s1716_s23] sm:$0xff]  ;;  %v1357_v26 = vpack.c.bf16 %v273_v23, %v272_v22  ;;  %v1393_v27 = vpack.c.bf16 %v380_v25, %v379_v24  ;;  %v275_v29 = vld [vmem:[%s1951_s4 + $0x48] sm:$0xff]  ;;  %v381_v30 = vld [vmem:[%s1952_s5 + $0x50] sm:$0xff] }
  0x21   : > { %1350 = vmatprep.subr.bf16.mxu0 %v1349_v14  ;;  %1235 = vmatprep.mubr.f32.mxu1 %v1725_v20  ;;  %v274_v28 = vld [vmem:[%s1951_s4 + $0x40] sm:$0xff]  ;;  %v382_v31 = vld [vmem:[%s1952_s5 + $0x58] sm:$0xff]  ;;  %v276_v34 = vld [vmem:[%s1951_s4 + $0x50] sm:$0xff] }
  0x22   : > { %1384 = vmatpush3.bf16.msra.mxu1 %v1381_v5  ;;  %1197 = vmatprep.mubr.f32.mxu0 %v1725_v20  ;;  %v1361_v32 = vpack.c.bf16 %v275_v29, %v274_v28  ;;  %v1397_v33 = vpack.c.bf16 %v382_v31, %v381_v30  ;;  %v277_v35 = vld [vmem:[%s1951_s4 + $0x58] sm:$0xff]  ;;  %v383_v36 = vld [vmem:[%s1952_s5 + $0x60] sm:$0xff]  ;;  %v384_v37 = vld [vmem:[%s1952_s5 + $0x68] sm:$0xff] }
  0x23   : > { %1386 = vmatprep.subr.bf16.mxu1 %v1385_v13  ;;  %v1365_v38 = vpack.c.bf16 %v277_v35, %v276_v34  ;;  %v1401_v39 = vpack.c.bf16 %v384_v37, %v383_v36  ;;  %v278_v40 = vld [vmem:[%s1951_s4 + $0x60] sm:$0xff]  ;;  %v279_v41 = vld [vmem:[%s1951_s4 + $0x68] sm:$0xff]  ;;  %v385_v42 = vld [vmem:[%s1952_s5 + $0x70] sm:$0xff] }
  0x24   : > { %1352 = vmatpush3.bf16.msra.mxu0 %v1349_v14  ;;  %v386_v43 = vld [vmem:[%s1952_s5 + $0x78] sm:$0xff]  ;;  %v1369_v44 = vpack.c.bf16 %v279_v41, %v278_v40  ;;  %v280_v46 = vld [vmem:[%s1951_s4 + $0x70] sm:$0xff]  ;;  %v472_v49 = vld [vmem:[%s1953_s6] sm:$0xff] }
  0x25   : > { %1354 = vmatprep.subr.bf16.mxu0 %v1353_v19  ;;  %v1405_v45 = vpack.c.bf16 %v386_v43, %v385_v42  ;;  %v281_v47 = vld [vmem:[%s1951_s4 + $0x78] sm:$0xff]  ;;  %v473_v50 = vld [vmem:[%s1953_s6 + $0x8] sm:$0xff]  ;;  %v1793_v53 = vld [vmem:[%s1716_s23 + $0x10] sm:$0xff] }
  0x26   : > { %1388 = vmatpush3.bf16.msra.mxu1 %v1385_v13  ;;  %v1373_v48 = vpack.c.bf16 %v281_v47, %v280_v46  ;;  %v1790_v51 = vld [vmem:[%s1716_s23 + $0x8] sm:$0xff]  ;;  %v1409_v52 = vpack.c.bf16 %v473_v50, %v472_v49  ;;  %v474_v54 = vld [vmem:[%s1953_s6 + $0x10] sm:$0xff]  ;;  %v475_v55 = vld [vmem:[%s1953_s6 + $0x18] sm:$0xff] }
  0x27   : > { %1390 = vmatprep.subr.bf16.mxu1 %v1389_v21  ;;  %v1804_v56 = vld [vmem:[%s1716_s23 + $0x18] sm:$0xff]  ;;  %v1413_v57 = vpack.c.bf16 %v475_v55, %v474_v54  ;;  %v476_v58 = vld [vmem:[%s1953_s6 + $0x20] sm:$0xff]  ;;  %v477_v59 = vld [vmem:[%s1953_s6 + $0x28] sm:$0xff]  ;;  %s261_s23 = scalar_lea.vmem %s1950_s3, %s1704_s16  ;;  %s1922_s16 = smov 0  }
  0x28   : > { %1356 = vmatpush3.bf16.msra.mxu0 %v1353_v19  ;;  %v1417_v60 = vpack.c.bf16 %v477_v59, %v476_v58  ;;  %v478_v61 = vld [vmem:[%s1953_s6 + $0x30] sm:$0xff]  ;;  %v479_v62 = vld [vmem:[%s1953_s6 + $0x38] sm:$0xff]  ;;  %v480_v0 = vld [vmem:[%s1953_s6 + $0x40] sm:$0xff] }
  0x29   : > { %1358 = vmatprep.subr.bf16.mxu0 %v1357_v26  ;;  %v1421_v63 = vpack.c.bf16 %v479_v62, %v478_v61  ;;  %v481_v1 = vld [vmem:[%s1953_s6 + $0x48] sm:$0xff]  ;;  %v482_v3 = vld [vmem:[%s1953_s6 + $0x50] sm:$0xff]  ;;  %v483_v4 = vld [vmem:[%s1953_s6 + $0x58] sm:$0xff] }
  0x2a   : > { %1392 = vmatpush3.bf16.msra.mxu1 %v1389_v21  ;;  %v1425_v2 = vpack.c.bf16 %v481_v1, %v480_v0  ;;  %v1429_v5 = vpack.c.bf16 %v483_v4, %v482_v3  ;;  %v484_v6 = vld [vmem:[%s1953_s6 + $0x60] sm:$0xff]  ;;  %v485_v7 = vld [vmem:[%s1953_s6 + $0x68] sm:$0xff]  ;;  %v486_v9 = vld [vmem:[%s1953_s6 + $0x70] sm:$0xff] }
  0x2b   : > { %1394 = vmatprep.subr.bf16.mxu1 %v1393_v27  ;;  %v1433_v8 = vpack.c.bf16 %v485_v7, %v484_v6  ;;  %v487_v10 = vld [vmem:[%s1953_s6 + $0x78] sm:$0xff]  ;;  %v574_v35 = vld [vmem:[%s256_s24 + $0x8] sm:$0xff] }
  0x2c   : > { %1360 = vmatpush3.bf16.msra.mxu0 %v1357_v26  ;;  %v1437_v11 = vpack.c.bf16 %v487_v10, %v486_v9  ;;  %v576_v42 = vld [vmem:[%s256_s24 + $0x18] sm:$0xff]  ;;  %v805_v9 = vld [vmem:[%s1954_s7 + $0x8] sm:$0xff] }
  0x2d   : > { %1362 = vmatprep.subr.bf16.mxu0 %v1361_v32 }
  0x2e   : > { %1396 = vmatpush3.bf16.msra.mxu1 %v1393_v27 }
  0x2f   : > { %1398 = vmatprep.subr.bf16.mxu1 %v1397_v33 }
  0x30   : > { %1364 = vmatpush3.bf16.msra.mxu0 %v1361_v32 }
  0x31   : > { %1366 = vmatprep.subr.bf16.mxu0 %v1365_v38 }
  0x32   : > { %1400 = vmatpush3.bf16.msra.mxu1 %v1397_v33  ;;  %v573_v33 = vld [vmem:[%s256_s24] sm:$0xff] }
  0x33   : > { %1402 = vmatprep.subr.bf16.mxu1 %v1401_v39 }
  0x34   : > { %1368 = vmatpush3.bf16.msra.mxu0 %v1365_v38  ;;  %v575_v38 = vld [vmem:[%s256_s24 + $0x10] sm:$0xff] }
  0x35   : > { %1370 = vmatprep.subr.bf16.mxu0 %v1369_v44 }
  0x36   : > { %1404 = vmatpush3.bf16.msra.mxu1 %v1401_v39 }
  0x37   : > { %1406 = vmatprep.subr.bf16.mxu1 %v1405_v45 }
  0x38   : > { %1372 = vmatpush3.bf16.msra.mxu0 %v1369_v44 }
  0x39   : > { %1374 = vmatprep.subr.bf16.mxu0 %v1373_v48 }
  0x3a   : > { %1408 = vmatpush3.bf16.msra.mxu1 %v1405_v45 }
  0x3c   : > { %1376 = vmatpush3.bf16.msra.mxu0 %v1373_v48 }
  0x3d   : > { %1236 = vmatmul.mubr.f32.vlgmr.msra.gmra.mrb[0].mxu1 %v1790_v51  ;;  %1410 = vmatprep.subr.bf16.mxu0 %v1409_v52 }
  0x3e   : > { %1238 = vmatprep.mubr.f32.mxu1 %v1793_v53 }
  0x3f   : > { %1198 = vmatmul.mubr.f32.vlgmr.msra.gmra.mrb[0].mxu0 %v1790_v51 }
  0x40   : > { %1200 = vmatprep.mubr.f32.mxu0 %v1793_v53  ;;  %1412 = vmatpush3.bf16.msra.mxu0 %v1409_v52 }
  0x41   : > { %1239 = vmatmul.mubr.f32.gmra.mrb[2].mxu1 %v1804_v56  ;;  %1414 = vmatprep.subr.bf16.mxu0 %v1413_v57 }
  0x43   : > { %1201 = vmatmul.mubr.f32.gmra.mrb[2].mxu0 %v1804_v56 }
  0x44   : > { %1273 = vmatprep.mubr.f32.mxu0 %v1725_v20  ;;  %1416 = vmatpush3.bf16.msra.mxu0 %v1413_v57 }
  0x45   : > { %1418 = vmatprep.subr.bf16.mxu0 %v1417_v60 }
  0x48   : > { %1420 = vmatpush3.bf16.msra.mxu0 %v1417_v60 }
  0x49   : > { %1422 = vmatprep.subr.bf16.mxu0 %v1421_v63 }
  0x4c   : > { %1424 = vmatpush3.bf16.msra.mxu0 %v1421_v63 }
  0x4d   : > { %1426 = vmatprep.subr.bf16.mxu0 %v1425_v2 }
  0x50   : > { %1428 = vmatpush3.bf16.msra.mxu0 %v1425_v2 }
  0x51   : > { %1430 = vmatprep.subr.bf16.mxu0 %v1429_v5 }
  0x54   : > { %1432 = vmatpush3.bf16.msra.mxu0 %v1429_v5 }
  0x55   : > { %1434 = vmatprep.subr.bf16.mxu0 %v1433_v8 }
  0x58   : > { %1436 = vmatpush3.bf16.msra.mxu0 %v1433_v8  ;;  %v804_v8 = vld [vmem:[%s1954_s7] sm:$0xff] }
  0x59   : > { %1438 = vmatprep.subr.bf16.mxu0 %v1437_v11  ;;  %v1457_v10 = vpack.c.bf16 %v805_v9, %v804_v8 }
  0x5c   : > { %1440 = vmatpush3.bf16.msra.mxu0 %v1437_v11 }
  0x5f   : > { %1274 = vmatmul.mubr.f32.vlgmr.msra.gmra.mrb[4].mxu0 %v1790_v51 }
  0x60   : > { %1276 = vmatprep.mubr.f32.mxu0 %v1793_v53 }
  0x63   : > { %1277 = vmatmul.mubr.f32.gmra.mrb[6].mxu0 %v1804_v56 }
 0x110   : > { %v1237_v12 = vpop.f32.mrb[0].mxu1 }
 0x111   : > { %v453_v13 = vpop.f32.mrb[1].mxu1 }
 0x112   : > { %v1441_v14 = vpack.c.bf16 %v1237_v12, %v453_v13  ;;  %v1199_v15 = vpop.f32.mrb[0].mxu0 }
 0x113   : > { %v348_v17 = vpop.f32.mrb[1].mxu0  ;;  %v368_v25 = vmul.f32 0.088388346, %v1199_v15 }
 0x114   : > { %1442 = vmatprep.subr.bf16.mxu0 %v1441_v14  ;;  %v1240_v16 = vpop.f32.mrb[2].mxu1  ;;  %v367_v19 = vmul.f32 0.088388346, %v348_v17  ;;  %v806_v17 = vld [vmem:[%s1954_s7 + $0x10] sm:$0xff] }
 0x115   : > { %1444 = vmatpush3.bf16.xpose.msra.mxu0 %v1441_v14  ;;  %v463_v18 = vpop.f32.mrb[3].mxu1 }
 0x116   : > { %v1445_v21 = vpack.c.bf16 %v1240_v16, %v463_v18  ;;  %v1202_v22 = vpop.f32.mrb[2].mxu0  ;;  %1287 = vmatprep.mubr.f32.mxu0 %v367_v19  ;;  %v807_v18 = vld [vmem:[%s1954_s7 + $0x18] sm:$0xff] }
 0x117   : > { %v358_v23 = vpop.f32.mrb[3].mxu0  ;;  %v370_v26 = vmul.f32 0.088388346, %v1202_v22 }
 0x118   : > { %1446 = vmatprep.subr.bf16.mxu0 %v1445_v21  ;;  %v369_v24 = vmul.f32 0.088388346, %v358_v23  ;;  %v1461_v23 = vpack.c.bf16 %v807_v18, %v806_v17 }
 0x11d   : > { %1448 = vmatpush3.bf16.xpose.msra.mxu0 %v1445_v21 }
 0x124   : > { %1288 = vmatmul.mubr.f32.vlgmr.msra.gmra.mrb[8].mxu0 %v368_v25  ;;  %v808_v25 = vld [vmem:[%s1954_s7 + $0x20] sm:$0xff] }
 0x125   : > { %1290 = vmatprep.mubr.f32.mxu0 %v369_v24 }
 0x128   : > { %1291 = vmatmul.mubr.f32.gmra.mrb[10].mxu0 %v370_v26  ;;  %v809_v26 = vld [vmem:[%s1954_s7 + $0x28] sm:$0xff] }
 0x132   : > { %v1275_v27 = vpop.f32.mrb[4].mxu0 }
 0x133   : > { %v554_v28 = vpop.f32.mrb[5].mxu0 }
 0x134   : > { %v1449_v29 = vpack.c.bf16 %v1275_v27, %v554_v28 }
 0x136   : > { %1450 = vmatprep.subr.bf16.mxu1 %v1449_v29  ;;  %v1278_v30 = vpop.f32.mrb[6].mxu0 }
 0x137   : > { %1452 = vmatpush3.bf16.msra.mxu1 %v1449_v29  ;;  %v564_v31 = vpop.f32.mrb[7].mxu0  ;;  %v1465_v29 = vpack.c.bf16 %v809_v26, %v808_v25 }
 0x138   : > { %v1453_v32 = vpack.c.bf16 %v1278_v30, %v564_v31  ;;  %v810_v30 = vld [vmem:[%s1954_s7 + $0x30] sm:$0xff]  ;;  %v811_v31 = vld [vmem:[%s1954_s7 + $0x38] sm:$0xff] }
 0x13a   : > { %1454 = vmatprep.subr.bf16.mxu1 %v1453_v32 }
 0x13b   : > { %1456 = vmatpush3.bf16.msra.mxu1 %v1453_v32  ;;  %v1469_v32 = vpack.c.bf16 %v811_v31, %v810_v30 }
 0x13c   : > { %1458 = vmatprep.subr.bf16.mxu1 %v1457_v10 }
 0x1f7   : > { %v1289_v34 = vpop.f32.mrb[8].mxu0 }
 0x1f8   : > { %v643_v36 = vpop.f32.mrb[9].mxu0  ;;  %v649_v39 = vadd.f32 %v1289_v34, %v574_v35  ;;  %v813_v34 = vld [vmem:[%s1954_s7 + $0x48] sm:$0xff] }
 0x1f9   : > { %v644_v37 = vadd.f32 %v643_v36, %v573_v33  ;;  %v812_v33 = vld [vmem:[%s1954_s7 + $0x40] sm:$0xff]  ;;  %v814_v36 = vld [vmem:[%s1954_s7 + $0x50] sm:$0xff] }
 0x1fa   : > { %v666_v46 = vsel %vm662_vm0, %v649_v39, -inf  ;;  %v1473_v35 = vpack.c.bf16 %v813_v34, %v812_v33 }
 0x1fb   : > { %v1292_v40 = vpop.f32.mrb[10].mxu0  ;;  %v663_v41 = vsel %vm662_vm0, %v644_v37, -inf }
 0x1fc   : > { %664 = vmax.xlane.f32.xlu0 %v663_v41  ;;  %v653_v43 = vpop.f32.mrb[11].mxu0  ;;  %v659_v45 = vadd.f32 %v1292_v40, %v576_v42  ;;  %v817_v40 = vld [vmem:[%s1954_s7 + $0x68] sm:$0xff]  ;;  %v818_v42 = vld [vmem:[%s1954_s7 + $0x70] sm:$0xff] }
 0x1fd   : > { %v654_v44 = vadd.f32 %v653_v43, %v575_v38  ;;  %v819_v43 = vld [vmem:[%s1954_s7 + $0x78] sm:$0xff] }
 0x1fe   : > { %v672_v48 = vsel %vm662_vm0, %v659_v45, -inf }
 0x1ff   : > { %v669_v47 = vsel %vm662_vm0, %v654_v44, -inf }
 0x200   : > { %667 = vmax.xlane.f32.xlu0 %v666_v46  ;;  %670 = vmax.xlane.f32.xlu1 %v669_v47  ;;  %v910_v46 = vld [vmem:[%s261_s23 + $0x8] sm:$0xff]  ;;  %v909_v47 = vld [vmem:[%s261_s23] sm:$0xff] }
 0x204   : > { %673 = vmax.xlane.f32.xlu1 %v672_v48  ;;  %v911_v48 = vld [vmem:[%s261_s23 + $0x10] sm:$0xff] }
 0x289   : > { %v665_v49 = vpop.xlane.xlu0 %664 }
 0x28a   : > { %v675_v50 = vsub.f32 %v644_v37, %v665_v49  ;;  %v815_v37 = vld [vmem:[%s1954_s7 + $0x58] sm:$0xff] }
 0x28b   : > { %v1477_v38 = vpack.c.bf16 %v815_v37, %v814_v36  ;;  %v912_v49 = vld [vmem:[%s261_s23 + $0x18] sm:$0xff] }
 0x28c   : > { %v679_v52 = vmul.f32 1.442695, %v675_v50 }
 0x28d   : > { %v668_v54 = vpop.xlane.xlu0 %667  ;;  %v671_v55 = vpop.xlane.xlu1 %670 }
 0x28e   : > { %1520 = vpow2.f32 %v679_v52  ;;  %v676_v57 = vsub.f32 %v649_v39, %v668_v54  ;;  %v677_v58 = vsub.f32 %v654_v44, %v671_v55  ;;  %v816_v39 = vld [vmem:[%s1954_s7 + $0x60] sm:$0xff]  ;;  %v1485_v44 = vpack.c.bf16 %v819_v43, %v818_v42 }
 0x28f   : > { %v1481_v41 = vpack.c.bf16 %v817_v40, %v816_v39 }
 0x290   : > { %v681_v59 = vmul.f32 1.442695, %v676_v57  ;;  %v683_v60 = vmul.f32 1.442695, %v677_v58 }
 0x291   : > { %v674_v61 = vpop.xlane.xlu1 %673 }
 0x292   : > { %1522 = vpow2.f32 %v681_v59  ;;  %v678_v62 = vsub.f32 %v659_v45, %v674_v61  ;;  %v1598_v45 = vmov 0  }
 0x293   : > { %1524 = vpow2.f32 %v683_v60  ;;  %1519 = vset.pattern.permute.xlu1 %v1598_v45  ;;  %1518 = vset.pattern.permute.xlu0 %v1598_v45 }
 0x294   : > { %v685_v63 = vmul.f32 1.442695, %v678_v62 }
 0x296   : > { %1526 = vpow2.f32 %v685_v63 }
 0x298   : > { %v1521_v0 = vpop.eup %1520 }
 0x299   : > { %v687_v1 = vsel %vm662_vm0, %v1521_v0, 0.0 }
 0x29a   : > { %688 = vadd.xlane.f32.xlu0 %v687_v1 }
 0x29c   : > { %v1523_v2 = vpop.eup %1522 }
 0x29d   : > { %v1525_v3 = vpop.eup %1524  ;;  %v690_v4 = vsel %vm662_vm0, %v1523_v2, 0.0 }
 0x29e   : > { %691 = vadd.xlane.f32.xlu1 %v690_v4  ;;  %v693_v5 = vsel %vm662_vm0, %v1525_v3, 0.0 }
 0x29f   : > { %694 = vadd.xlane.f32.xlu0 %v693_v5 }
 0x2a0   : > { %v1527_v6 = vpop.eup %1526 }
 0x2a1   : > { %v696_v7 = vsel %vm662_vm0, %v1527_v6, 0.0 }
 0x2a2   : > { %697 = vadd.xlane.f32.xlu1 %v696_v7 }
 0x2b3   : > { %920 = vperm.xlu1 %1519, %v910_v46  }
 0x2b5   : > { %915 = vperm.xlu0 %1518, %v909_v47  }
 0x2b7   : > { %925 = vperm.xlu1 %1519, %v911_v48  }
 0x2bb   : > { %930 = vperm.xlu1 %1519, %v912_v49  }
 0x327   : > { %v689_v11 = vpop.xlane.xlu0 %688 }
 0x328   : > { %1528 = vrcp.f32 %v689_v11 }
 0x32b   : > { %v692_v12 = vpop.xlane.xlu1 %691 }
 0x32c   : > { %v695_v13 = vpop.xlane.xlu0 %694  ;;  %1530 = vrcp.f32 %v692_v12 }
 0x32d   : > { %1532 = vrcp.f32 %v695_v13 }
 0x32f   : > { %v698_v14 = vpop.xlane.xlu1 %697 }
 0x330   : > { %1534 = vrcp.f32 %v698_v14 }
 0x332   : > { %v1529_v15 = vpop.eup %1528 }
 0x333   : > { %v703_v16 = vmul.f32 %v1529_v15, %v1521_v0  ;;  %v921_v57 = vpop.permute.xlu1 %920 }
 0x334   : > { %v916_v62 = vpop.permute.xlu0 %915 }
 0x335   : > { %1301 = vmatprep.mubr.msk.f32.mxu1 %vm662_vm0, %v703_v16 }
 0x336   : > { %v1531_v19 = vpop.eup %1530 }
 0x337   : > { %v1533_v21 = vpop.eup %1532  ;;  %v704_v22 = vmul.f32 %v1531_v19, %v1523_v2  ;;  %v926_v58 = vpop.permute.xlu1 %925 }
 0x338   : > { %v705_v24 = vmul.f32 %v1533_v21, %v1525_v3 }
 0x339   : > { %1302 = vmatmul.mubr.msk.f32.vlgmr.msra.gmra.mrb[4].mxu1 %vm662_vm0, %v704_v22 }
 0x33a   : > { %v1535_v27 = vpop.eup %1534  ;;  %1304 = vmatprep.mubr.msk.f32.mxu1 %vm662_vm0, %v705_v24  ;;  %1460 = vmatpush3.bf16.msra.mxu1 %v1457_v10 }
 0x33b   : > { %v706_v28 = vmul.f32 %v1535_v27, %v1527_v6  ;;  %1462 = vmatprep.subr.bf16.mxu1 %v1461_v23  ;;  %v931_v5 = vpop.permute.xlu1 %930 }
 0x33d   : > { %1305 = vmatmul.mubr.msk.f32.gmra.mrb[6].mxu1 %vm662_vm0, %v706_v28 }
 0x33e   : > { %1464 = vmatpush3.bf16.msra.mxu1 %v1461_v23 }
 0x33f   : > { %1466 = vmatprep.subr.bf16.mxu1 %v1465_v29 }
 0x342   : > { %1468 = vmatpush3.bf16.msra.mxu1 %v1465_v29 }
 0x343   : > { %1470 = vmatprep.subr.bf16.mxu1 %v1469_v32 }
 0x346   : > { %1472 = vmatpush3.bf16.msra.mxu1 %v1469_v32 }
 0x347   : > { %1474 = vmatprep.subr.bf16.mxu1 %v1473_v35 }
 0x34a   : > { %1476 = vmatpush3.bf16.msra.mxu1 %v1473_v35 }
 0x34b   : > { %1478 = vmatprep.subr.bf16.mxu1 %v1477_v38 }
 0x34e   : > { %1480 = vmatpush3.bf16.msra.mxu1 %v1477_v38 }
 0x34f   : > { %1482 = vmatprep.subr.bf16.mxu1 %v1481_v41 }
 0x352   : > { %1484 = vmatpush3.bf16.msra.mxu1 %v1481_v41 }
 0x353   : > { %1486 = vmatprep.subr.bf16.mxu1 %v1485_v44 }
 0x356   : > { %1488 = vmatpush3.bf16.msra.mxu1 %v1485_v44 }
 0x40c   : > { %v1303_v50 = vpop.f32.mrb[4].mxu1 }
 0x40d   : > { %v785_v52 = vpop.f32.mrb[5].mxu1 }
 0x40e   : > { %1339 = vmatprep.mubr.f32.mxu1 %v785_v52 }
 0x40f   : > { %1340 = vmatmul.mubr.f32.vlgmr.msra.gmra.mrb[8].mxu1 %v1303_v50 }
 0x410   : > { %v1306_v54 = vpop.f32.mrb[6].mxu1 }
 0x411   : > { %v795_v55 = vpop.f32.mrb[7].mxu1 }
 0x412   : > { %1342 = vmatprep.mubr.f32.mxu1 %v795_v55 }
 0x413   : > { %1343 = vmatmul.mubr.f32.gmra.mrb[10].mxu1 %v1306_v54 }
 0x4e2   : > { %v1341_v59 = vpop.f32.mrb[8].mxu1 }
 0x4e3   : > { %v906_v60 = vadd.f32 %v1341_v59, %v1790_v51  ;;  %v886_v61 = vpop.f32.mrb[9].mxu1 }
 0x4e4   : > { %v905_v63 = vadd.f32 %v886_v61, %v1725_v20 }
 0x4e5   : > { %v934_v0 = vmul.f32 %v921_v57, %v906_v60 }
 0x4e6   : > { %v933_v1 = vmul.f32 %v916_v62, %v905_v63  ;;  %v1344_v2 = vpop.f32.mrb[10].mxu1 }
 0x4e7   : > { %938 = vst [vmem:[#allocation2 + $0x8] sm:$0xff] %v934_v0  ;;  %v908_v3 = vadd.f32 %v1344_v2, %v1804_v56  ;;  %v896_v4 = vpop.f32.mrb[11].mxu1 }
 0x4e8   : > { %937 = vst [vmem:[#allocation2] sm:$0xff] %v933_v1  ;;  %v907_v6 = vadd.f32 %v896_v4, %v1793_v53 }
 0x4e9   : > { %v936_v7 = vmul.f32 %v931_v5, %v908_v3 }
 0x4ea   : > { %v935_v8 = vmul.f32 %v926_v58, %v907_v6 }
 0x4eb   : > { %940 = vst [vmem:[#allocation2 + $0x18] sm:$0xff] %v936_v7 }
 0x4ec   : > { %939 = vst [vmem:[#allocation2 + $0x10] sm:$0xff] %v935_v8 }
 0x4ed LB: >> { %s947_s21 = sshra.s32 %s1595_s16, 7  ;;  %s952_s22 = sand.u32 127, %s1595_s16  ;;  %s1595_s16 = sphi %s1922_s16, %s946_s16  }
 0x4ee   : >> { %s949_s24 = sadd.s32 %s1659_s13, %s947_s21  ;;  %s1063_s28 = sshll.u32 %s1659_s13, 7 }
 0x4ef   : >> { %s1062_s25 = sshll.u32 %s949_s24, 7  ;;  %s955_s29 = scalar_lea.vmem [#allocation2], %s1595_s16 }
 0x4f0   : >> { %s953_s26 = sadd.s32 %s1062_s25, %s952_s22  ;;  %s967_s10 = sshll.u32 %s955_s29, 4  ;;  %s968_s10 = int_to_ptr.vmem [resolvable:$true] %s967_s10 }
 0x4f1   : >> { %s954_s27 = sld [smem:[#allocation4 + %s953_s26]]  ;;  %s1551_s17 = scalar_lea.vmem %s968_s10, 16 }
 0x4f2   : >> { %p1552_p13 = scmp.ne.s32.totalorder %s968_s10, %s1551_s17  ;;  %s1599_s18 = smov [#allocation2]  }
 0x4f3   : >> { %s1553_s19 = sshll.u32 %s1599_s18, 4  ;;  %s1554_s19 = int_to_ptr.vmem [resolvable:$false] %s1553_s19 }
 0x4f4   : >> { %s1555_s20 = scalar_lea.vmem %s1554_s19, 512  ;;  %p1556_p0 = scmp.lt.s32.totalorder %s968_s10, %s1554_s19 }
 0x4f5   : >> { %p1557_p1 = scmp.lt.s32.totalorder %s1555_s20, %s1551_s17 }
 0x4f7   : >> { %s957_s11 = sadd.s32 %s1063_s28, %s954_s27  ;;  %p1558_p2 = por %p1557_p1, %p1556_p0 }
 0x4f8   : >> { %s1064_s12 = sshll.u32 %s957_s11, 4 }
 0x4f9   : >> { %s959_s15 = scalar_lea.hbm %s1956_s9, %s1064_s12  ;;  %p1559_p3 = pnand %p1558_p2, %p1552_p13 }
 0x4fb   : >> { %1562 = shalt.err (!%p1559_p3)  }
 0x4fc   : >> { %s1563_s23 = scalar_lea.hbm %s959_s15, 16  ;;  %s1565_s24 = scalar_lea.hbm %s1956_s9, 4096 }
 0x4fd   : >> { %p1564_p4 = scmp.ne.s32.totalorder %s959_s15, %s1563_s23  ;;  %p1566_p5 = scmp.lt.u32.totalorder %s959_s15, %s1956_s9 }
 0x4fe   : >> { %p1567_p6 = scmp.lt.u32.totalorder %s1565_s24, %s1563_s23  ;;  %p1569_p8 = scmp.lt.u32.totalorder %s1563_s23, %s959_s15 }
 0x500   : >> { %p1568_p7 = por %p1567_p6, %p1566_p5 }
 0x502   : >> { %p1570_p9 = por %p1569_p8, %p1568_p7 }
 0x504   : >> { %p1571_p10 = pnand %p1570_p9, %p1564_p4 }
 0x506   : >> { %1574 = shalt.err (!%p1571_p10)  }
 0x507   : >> { %970 = dma.vmem_to_hbm [thread:$0]  %s968_s10, 16, %s959_s15, [#allocation3] }
 0x508   : >> { %1587 = dma.done.wait [#allocation3], 16 }
 0x509   : >> { %1588 = vsyncadd [#allocation3], 4294967280  ;;  %s946_s16 = sadd.s32 1, %s1595_s16  }
 0x50a   : >> { %p943_p11 = scmp.ge.s32.totalorder %s946_s16, 31  }
 0x50c   : > { %945 = sbr.rel (!%p943_p11) target bundleno = 1261 (0x4ed), region = 90 }
 0x513 PF: > { %s20_s30 = sadd.s32 1, %s1591_s30  }
 0x514   : > { %p17_p12 = scmp.ge.s32.totalorder %s20_s30, 3  }
 0x516   :  { %19 = sbr.rel (!%p17_p12) target bundleno = 1 (0x1), region = 101 }
 0x51d   :  { %975 = vsyncpa [#allocation5], 1 }
 0x51e   :  { %977 = vsyncpa [#allocation5 + $0x1], 1 }
 0x51f   :  { %978 = vsyncmov [#allocation3] }
 0x522   :  { %s979_s27 = vpop.sfrf %978 }
 0x523   :  { %p1065_p13 = scmp.ne.s32.totalorder %s979_s27, 0 }
 0x525   :  { %983 = shalt.err (%p1065_p13)  }

</bundles_post_ra>
